<compile_context>
chip_gen: v5e
topology: v5e:2x2
jax: 0.10.0
libtpu: 0.0.40
codegen_flags: <defaults>
</compile_context>

<pallas_src>
import math

import jax
import jax.numpy as jnp
import numpy as np
from jax.experimental import pallas as pl
from jax.experimental.pallas import tpu as pltpu

N_HOUR = 24
N_DAY = 7


def make_sinusoidal_pe(max_seq_len, d_model):
    """Buffer `pe` exactly as in the torch __init__ (glue, not hot path)."""
    position = jnp.arange(max_seq_len, dtype=jnp.float32)[:, None]
    div_term = jnp.exp(
        jnp.arange(0, d_model, 2, dtype=jnp.float32) * (-math.log(10000.0) / d_model)
    )
    angles = position * div_term  # (L, D/2)
    pe = jnp.zeros((max_seq_len, d_model), jnp.float32)
    pe = pe.at[:, 0::2].set(jnp.sin(angles))
    pe = pe.at[:, 1::2].set(jnp.cos(angles))
    return pe


def _tape_kernel(x_ref, te_ref, out_ref):
    """out[i, j, s, :] = x[j, s, :] + te[i, s, :].

    x_ref : (tj, ts, D)      — resident across the innermost i axis
    te_ref: (ti, ts, D)      — pe + time_embed + bias, precomputed in XLA
    out_ref: (ti, tj, ts, D) — lane-dense store (D on the lane axis)
    """
    x = x_ref[...]    # (tj, ts, D)
    te = te_ref[...]  # (ti, ts, D), f32
    out_ref[...] = (x[None, :, :, :] + te[:, None, :, :]).astype(out_ref.dtype)
    # TODO(synk): dropout (p=0.1) is stochastic in training mode; implemented
    # here as eval-mode identity.


def _vmem_budget_bytes():
    try:
        cap = int(pltpu.get_tpu_info().vmem_capacity_bytes)
    except Exception:  # pragma: no cover - info query unavailable
        cap = 128 * 1024 * 1024
    # ~45% of physical VMEM for kernel tiles, capped at 48 MiB: leaves compiler
    # scratch headroom under v7x's 64 MiB and uses v5e/v6e's 128 MiB well.
    return cap, min(int(cap * 0.45), 48 * 1024 * 1024)


def _footprint(ti, tj, ts, D, itemsize):
    out_b = 2 * ti * tj * ts * D * itemsize   # out double-buffer
    x_b = 2 * tj * ts * D * itemsize          # x double-buffer (resident over i)
    te_b = 2 * ti * ts * D * 4                # te double-buffer (f32)
    return out_b + x_b + te_b


def _choose_tiles(B, S, D, itemsize):
    """Pick (ti, tj, ts) sized to the current generation's VMEM."""
    cap, budget = _vmem_budget_bytes()
    ti, tj, ts = 1, B, S

    def fits(ti_, tj_, ts_):
        return _footprint(ti_, tj_, ts_, D, itemsize) <= budget

    # 1) shrink the x-batch tile first (prefer divisors of B).
    while tj > 1 and not fits(ti, tj, ts):
        tj -= 1
        while tj > 1 and B % tj:
            tj -= 1
    # 2) then shrink the sequence tile; no S-divisibility requirement (Pallas
    #    masks ragged edge blocks) but keep ts a multiple of 8 for sublanes.
    while ts > 8 and not fits(ti, tj, ts):
        ts = max(8, (ts // 2 + 7) // 8 * 8)
    # 3) grow the i tile with leftover budget: bigger out tiles amortize the
    #    ~0.35us per-grid-step overhead and collapse the grid for tiny inputs.
    if tj == B and ts == S:
        while ti < B and fits(ti + 1, tj, ts):
            ti += 1
    # 4) v7x has 2 TensorCores: give the parallel (j, s) axes >= 2 blocks when
    #    the problem is big enough to matter.
    big = B * B * S * D * itemsize > 8 * 1024 * 1024
    if big and pl.cdiv(B, tj) * pl.cdiv(S, ts) == 1:
        if S >= 16:
            ts = max(8, (S // 2 + 7) // 8 * 8)
        elif B >= 2:
            tj = max(1, B // 2)
    return ti, tj, ts, cap, budget


def time_aware_positional_encoding(x, time_features, params, pe_full):
    B, S, D = x.shape
    assert D % 4 == 0
    itemsize = jnp.dtype(x.dtype).itemsize
    ti, tj, ts, cap, _ = _choose_tiles(B, S, D, itemsize)

    # ---- glue (tiny (B,S,D) work, done once in XLA outside the kernel) -----
    hour = time_features[:, :, 0].astype(jnp.int32)                    # (B, S)
    day = time_features[:, :, 1].astype(jnp.int32)                     # (B, S)
    time_embed = jnp.concatenate(
        [params["hour_tbl"][hour], params["day_tbl"][day]], axis=-1)   # (B,S,D/2)
    time_embed = time_embed @ params["w_proj"] + params["b_proj"]      # (B, S, D)
    te_all = (pe_full[None, :S, :] + time_embed).astype(jnp.float32)   # (B, S, D)

    ni, nj, ns = pl.cdiv(B, ti), pl.cdiv(B, tj), pl.cdiv(S, ts)
    grid = (nj, ns, ni)  # i innermost: x tile stays resident across i steps

    footprint = _footprint(ti, tj, ts, D, itemsize)
    vmem_bytes = int(min(cap, max(footprint + 4 * 1024 * 1024, 32 * 1024 * 1024)))

    # x read once, te re-read once per j tile, out written once.
    cost = pl.CostEstimate(
        flops=B * B * S * D,
        transcendentals=0,
        bytes_accessed=B * B * S * D * itemsize
        + B * S * D * itemsize
        + B * S * D * 4 * nj)

    # TODO(synk): for d_model not a multiple of 128, pad D (or fold ts into the
    # trailing dim) to keep stores as unmasked lane-dense vst; D=128 here.
    out = pl.pallas_call(
        _tape_kernel,
        out_shape=jax.ShapeDtypeStruct((B, B, S, D), x.dtype),
        grid_spec=pltpu.PrefetchScalarGridSpec(
            num_scalar_prefetch=0,
            grid=grid,
            in_specs=[
                # x tile: index independent of i -> kept resident in VMEM.
                pl.BlockSpec((tj, ts, D), lambda j, s, i: (j, s, 0)),
                # te tile: pe + time_embed(i) + bias, precomputed in XLA.
                pl.BlockSpec((ti, ts, D), lambda j, s, i: (i, s, 0)),
            ],
            out_specs=pl.BlockSpec((ti, tj, ts, D),
                                   lambda j, s, i: (i, j, s, 0)),
        ),
        compiler_params=pltpu.CompilerParams(
            # j/s tiles are independent (megacore shards them on v7x); i is the
            # innermost streaming axis and stays "arbitrary".
            dimension_semantics=("parallel", "parallel", "arbitrary"),
            vmem_limit_bytes=vmem_bytes),
        cost_estimate=cost,
    )(x, te_all)
    return out


def reference_forward(x, time_features, params, pe_full):
    """Pure-JAX reference mirroring the torch forward (eval mode)."""
    B, S, D = x.shape
    hour = time_features[:, :, 0].astype(jnp.int32)
    day = time_features[:, :, 1].astype(jnp.int32)
    hour_embed = params["hour_tbl"][hour]                          # (B, S, D/4)
    day_embed = params["day_tbl"][day]                             # (B, S, D/4)
    time_embed = jnp.concatenate([hour_embed, day_embed], -1)      # (B, S, D/2)
    time_embed = time_embed @ params["w_proj"] + params["b_proj"]  # (B, S, D)
    pos_encoding = pe_full[None, :S, :]                            # (1, S, D)
    time_aware_pe = pos_encoding + time_embed[:, None, :, :]       # (B, 1, S, D)
    return x + time_aware_pe                                       # (B, B, S, D)


def init_params(key, d_model):
    k1, k2, k3, k4 = jax.random.split(key, 4)
    d_in = d_model // 2
    bound = 1.0 / math.sqrt(d_in)
    # nn.Embedding default init ~ N(0,1); nn.Linear ~ U(-1/sqrt(in), 1/sqrt(in)).
    hour_tbl = jax.random.normal(k1, (N_HOUR, d_model // 4), jnp.float32)
    day_tbl = jax.random.normal(k2, (N_DAY, d_model // 4), jnp.float32)
    w_lin = jax.random.uniform(k3, (d_model, d_in), jnp.float32, -bound, bound)
    b_lin = jax.random.uniform(k4, (d_model,), jnp.float32, -bound, bound)
    return {
        "hour_tbl": hour_tbl,
        "day_tbl": day_tbl,
        "w_proj": w_lin.T,   # stored as (d_in, d_out) so forward does x @ w
        "b_proj": b_lin,
    }


if __name__ == "__main__":
    # d_model = 128 keeps the output lane-dense (multiple of 128).
    B, S, D, MAX_LEN = 2, 8, 128, 120

    key = jax.random.PRNGKey(0)
    kx, kh, kd, kp = jax.random.split(key, 4)

    x = jax.random.normal(kx, (B, S, D), jnp.float32)
    hours = jax.random.randint(kh, (B, S, 1), 0, N_HOUR)
    days = jax.random.randint(kd, (B, S, 1), 0, N_DAY)
    time_features = jnp.concatenate([hours, days], axis=-1).astype(jnp.float32)  # (B, S, 2)

    params = init_params(kp, D)
    pe_full = make_sinusoidal_pe(MAX_LEN, D)

    out = time_aware_positional_encoding(x, time_features, params, pe_full)
    out = jax.block_until_ready(out)

    ref = reference_forward(x, time_features, params, pe_full)
    np.testing.assert_allclose(np.asarray(out), np.asarray(ref), rtol=1e-5, atol=1e-5)

    print("KERNEL_OK")
</pallas_src>

<mosaic_0001>
module attributes {stable_mosaic.version = 11 : i64} {
  func.func @_tape_kernel(%arg0: i32, %arg1: i32, %arg2: i32, %arg3: memref<2x8x128xf32, #tpu.memory_space<vmem>>, %arg4: memref<2x8x128xf32, #tpu.memory_space<vmem>>, %arg5: memref<2x2x8x128xf32, #tpu.memory_space<vmem>>) attributes {dimension_semantics = [#tpu.dimension_semantics<parallel>, #tpu.dimension_semantics<parallel>, #tpu.dimension_semantics<arbitrary>], iteration_bounds = array<i64: 1, 1, 1>, scalar_prefetch = 0 : i64, scratch_operands = 0 : i64, tpu.core_type = #tpu.core_type<tc>, window_params = [{transform_indices = @transform_0, window_bounds = array<i64: 2, 8, 128>}, {transform_indices = @transform_1, window_bounds = array<i64: 2, 8, 128>}, {transform_indices = @transform_2, window_bounds = array<i64: 2, 2, 8, 128>}]} {
    %c0 = arith.constant 0 : index
    %c0_0 = arith.constant 0 : index
    %c0_1 = arith.constant 0 : index
    %0 = vector.load %arg3[%c0, %c0_0, %c0_1] : memref<2x8x128xf32, #tpu.memory_space<vmem>>, vector<2x8x128xf32>
    %c0_2 = arith.constant 0 : index
    %c0_3 = arith.constant 0 : index
    %c0_4 = arith.constant 0 : index
    %1 = vector.load %arg4[%c0_2, %c0_3, %c0_4] : memref<2x8x128xf32, #tpu.memory_space<vmem>>, vector<2x8x128xf32>
    %2 = vector.shape_cast %0 : vector<2x8x128xf32> to vector<1x2x8x128xf32>
    %3 = vector.shape_cast %1 : vector<2x8x128xf32> to vector<2x1x8x128xf32>
    %4 = vector.broadcast %2 : vector<1x2x8x128xf32> to vector<2x2x8x128xf32>
    %5 = vector.broadcast %3 : vector<2x1x8x128xf32> to vector<2x2x8x128xf32>
    %6 = arith.addf %4, %5 : vector<2x2x8x128xf32>
    %c0_5 = arith.constant 0 : index
    %c0_6 = arith.constant 0 : index
    %c0_7 = arith.constant 0 : index
    %c0_8 = arith.constant 0 : index
    %7 = vector.load %arg5[%c0_5, %c0_6, %c0_7, %c0_8] : memref<2x2x8x128xf32, #tpu.memory_space<vmem>>, vector<2x2x8x128xf32>
    tpu.vector_store %arg5[%c0_5, %c0_6, %c0_7, %c0_8], %6 {strides = array<i32>} : memref<2x2x8x128xf32, #tpu.memory_space<vmem>>, vector<2x2x8x128xf32>,
    return
  }
  func.func @transform_0(%arg0: i32, %arg1: i32, %arg2: i32) -> (i32, i32, i32) {
    %c0_i32 = arith.constant 0 : i32
    %c0_i32_0 = arith.constant 0 : i32
    return %arg0, %arg1, %c0_i32 : i32, i32, i32
  }
  func.func @transform_1(%arg0: i32, %arg1: i32, %arg2: i32) -> (i32, i32, i32) {
    %c0_i32 = arith.constant 0 : i32
    %c0_i32_0 = arith.constant 0 : i32
    return %arg2, %arg1, %c0_i32 : i32, i32, i32
  }
  func.func @transform_2(%arg0: i32, %arg1: i32, %arg2: i32) -> (i32, i32, i32, i32) {
    %c0_i32 = arith.constant 0 : i32
    %c0_i32_0 = arith.constant 0 : i32
    return %arg2, %arg0, %arg1, %c0_i32 : i32, i32, i32, i32
  }
}

</mosaic_0001>

<bundles_post_ra>
// kernel: tpu_custom_call.1
= control target key start
LH: loop header
LB: loop body
LE: loop exit
PB: predicated region body
PF: predicated region fallthrough
CT: control target
= control target key end

     0   :  { %7 = vsyncpa [#allocation3], 0  ;;  %s197_s0 = inlined_call_operand.hbm [shape: f32[2,8,128], index: 0, kind: input, shape index: {}]   ;;  %s198_s1 = inlined_call_operand.hbm [shape: f32[2,8,128], index: 1, kind: input, shape index: {}]   ;;  %s199_s2 = inlined_call_operand.hbm [shape: f32[2,2,8,128], index: 2, kind: output, shape index: {}]  }
   0x1   :  { %8 = vsyncpa [#allocation6], 0 }
   0x2   :  { %9 = vsyncpa [#allocation4], 0  ;;  %s14_s11 = sshll.u32 %s197_s0, 4  ;;  %s159_s12 = smov [#allocation2]   ;;  %s15_s11 = int_to_ptr.hbm [resolvable:$true] %s14_s11 }
   0x3   :  { %s16_s13 = sshll.u32 %s159_s12, 4  ;;  %s27_s16 = sshll.u32 %s198_s1, 4  ;;  %s17_s13 = int_to_ptr.vmem [resolvable:$true] %s16_s13  ;;  %s28_s16 = int_to_ptr.hbm [resolvable:$true] %s27_s16 }
   0x4   :  { %s160_s17 = smov 128   ;;  %s161_s18 = smov 8  }
   0x5   :  { %22 = dma.hbm_to_vmem [thread:$0]  %s15_s11, 256, %s17_s13, [#allocation3], %s160_s17, %s160_s17, %s161_s18  }
   0x6   :  { %s162_s19 = smov [#allocation5]  }
   0x7   :  { %s29_s20 = sshll.u32 %s162_s19, 4  ;;  %s30_s20 = int_to_ptr.vmem [resolvable:$true] %s29_s20 }
   0x8   :  { %35 = dma.hbm_to_vmem [thread:$0]  %s28_s16, 256, %s30_s20, [#allocation6], %s160_s17, %s160_s17, %s161_s18  }
   0x9   :  { %153 = dma.done.wait [#allocation3], 256  }
   0xa   :  { %154 = vsyncadd [#allocation3], 4294967040 }
   0xb   :  { %155 = dma.done.wait [#allocation6], 256  }
   0xc   :  { %156 = vsyncadd [#allocation6], 4294967040  ;;  %v44_v0 = vld [vmem:[#allocation2] sm:$0xff]  ;;  %v46_v1 = vld [vmem:[#allocation5] sm:$0xff]  ;;  %s163_s0 = smov [#allocation7]   ;;  %s62_s23 = sshll.u32 %s199_s2, 4  ;;  %s63_s23 = int_to_ptr.hbm [resolvable:$true] %s62_s23 }
   0xd   :  { %v45_v2 = vld [vmem:[#allocation2 + $0x8] sm:$0xff]  ;;  %v48_v3 = vadd.f32 %v46_v1, %v44_v0  ;;  %v47_v5 = vld [vmem:[#allocation5 + $0x8] sm:$0xff]  ;;  %s60_s1 = sshll.u32 %s163_s0, 4  ;;  %s61_s1 = int_to_ptr.vmem [resolvable:$true] %s60_s1 }
   0xe   :  { %v49_v4 = vadd.f32 %v46_v1, %v45_v2  ;;  %v50_v6 = vadd.f32 %v47_v5, %v44_v0  ;;  %v51_v7 = vadd.f32 %v47_v5, %v45_v2 }
   0xf   :  { %52 = vst [vmem:[#allocation7] sm:$0xff] %v48_v3 }
  0x10   :  { %53 = vst [vmem:[#allocation7 + $0x8] sm:$0xff] %v49_v4 }
  0x11   :  { %54 = vst [vmem:[#allocation7 + $0x10] sm:$0xff] %v50_v6 }
  0x12   :  { %55 = vst [vmem:[#allocation7 + $0x18] sm:$0xff] %v51_v7 }
  0x13   :  { %68 = dma.vmem_to_hbm [thread:$0]  %s61_s1, 512, %s63_s23, [#allocation4], %s160_s17, %s160_s17, %s161_s18  }
  0x14   :  { %157 = dma.done.wait [#allocation4], 512  }
  0x15   :  { %158 = vsyncadd [#allocation4], 4294966784 }
  0x16   :  { %73 = vsyncpa [#allocation3], 1 }
  0x17   :  { %74 = vsyncpa [#allocation6], 1 }
  0x18   :  { %75 = vsyncpa [#allocation4], 1 }

</bundles_post_ra>
